<compile_context>
chip_gen: v6e
topology: v6e:2x2x1
jax: 0.10.0
libtpu: 0.0.40
codegen_flags: <defaults>
</compile_context>

<pallas_src>
import math
from functools import partial

import jax
import jax.numpy as jnp
from jax import lax
from jax.experimental import pallas as pl
from jax.experimental.pallas import tpu as pltpu


# --------------------------------------------------------------------------------------
# Pallas kernel: one fused MXU matmul + bias_act epilogue per (batch, hw-tile) grid step.
# --------------------------------------------------------------------------------------
def _synthesis_kernel(wd_ref, xcols_ref, noise_ref, bconv_ref, out_ref,
                      *, act_gain, act_clamp, lrelu_alpha):
    f32 = jnp.float32

    # ---- single fused MXU matmul: bf16 inputs, f32 accumulation ----
    # wd_ref:    (1, Cout, KKC) bf16  -- per-batch demodulated weight (precomputed in wrapper)
    # xcols_ref: (1, KKC, tile) bf16  -- im2col columns for this hw tile
    y = jnp.dot(wd_ref[0], xcols_ref[0], preferred_element_type=f32)   # (Cout, tile)

    # ---- epilogue: noise, bias, leaky-ReLU, gain, clamp (HW is the lane axis) ----
    y = y + noise_ref[0].astype(f32)        # (1, tile) row broadcast
    y = y + bconv_ref[...].astype(f32)      # (Cout, 1) column broadcast
    y = jnp.where(y >= 0.0, y, lrelu_alpha * y)
    y = y * act_gain
    if act_clamp is not None:
        y = jnp.clip(y, -act_clamp, act_clamp)
    out_ref[0] = y.astype(out_ref.dtype)


# --------------------------------------------------------------------------------------
# Wrapper-side staging: affine (+LoRA), modulation, demodulation, im2col, noise, bias.
# All per-batch weight math stays in f32; only the two MXU operands are cast to bf16.
# --------------------------------------------------------------------------------------
def _stage_inputs(x, w, params, *, noise_mode, gain, noise_key):
    B, Cin, H, Wd = x.shape
    w_dim = w.shape[1]
    conv_w = params["conv_weight"]                         # (Cout, Cin, K, K)
    Cout, _, K, _ = conv_w.shape
    pad = K // 2
    scaling = params["lora_alpha"] / params["r"]
    HW = H * Wd
    KKC = K * K * Cin
    f32 = jnp.float32

    # ---- affine FullyConnectedLayerWrapper (+LoRA), hoisted: one batched matmul ----
    fc_wgain = 1.0 / math.sqrt(w_dim)                      # FullyConnectedLayer weight_gain
    styles = (w @ (params["fc_weight"].T * fc_wgain)
              + params["fc_bias"][None, :]                 # bias_gain = 1
              + (w @ params["fc_lora_A"].T @ params["fc_lora_B"].T) * scaling)   # (B, Cin)

    # ---- effective conv weight (base + LoRA) + per-batch modulation / demodulation ----
    delta = (params["conv_lora_B"] @ params["conv_lora_A"]).reshape(conv_w.shape)
    weight_eff = conv_w + delta * scaling                                   # (Cout, Cin, K, K)
    wmod = weight_eff[None] * styles[:, None, :, None, None]               # (B, Cout, Cin, K, K)
    dcoefs = lax.rsqrt(jnp.sum(wmod * wmod, axis=(2, 3, 4), keepdims=True) + 1e-8)
    w_demod = wmod * dcoefs                                                 # demod folded in
    # tap-major (ky, kx, cin) contraction layout matching x_cols; bf16 for the MXU
    w_demod_t = jnp.transpose(w_demod, (0, 1, 3, 4, 2)).reshape(B, Cout, KKC)
    w_demod_t = w_demod_t.astype(jnp.bfloat16)

    # ---- im2col with taps concatenated on the contraction axis, cast to bf16 ----
    x_pad = jnp.pad(x, ((0, 0), (0, 0), (pad, pad), (pad, pad)))
    taps = [x_pad[:, :, ky:ky + H, kx:kx + Wd].reshape(B, Cin, HW)
            for ky in range(K) for kx in range(K)]
    x_cols = jnp.concatenate(taps, axis=1).astype(jnp.bfloat16)             # (B, KKC, HW)

    # ---- noise as a lane-dense row; batch-invariant when possible ----
    if noise_mode == "random":
        if noise_key is None:
            raise ValueError("noise_mode='random' requires an explicit noise_key")
        noise_rows = (jax.random.normal(noise_key, (B, 1, HW), f32)
                      * params["noise_strength"])
        noise_per_batch = True
    elif noise_mode == "const":
        noise_rows = (params["noise_const"] * params["noise_strength"]
                      ).reshape(1, 1, HW).astype(f32)
        noise_per_batch = False
    else:  # "none"
        noise_rows = jnp.zeros((1, 1, HW), f32)
        noise_per_batch = False

    conv_b = params["conv_bias"].reshape(Cout, 1).astype(f32)

    act_gain = math.sqrt(2.0) * gain                      # lrelu def_gain * gain
    act_clamp = (params["conv_clamp"] * gain) if params["conv_clamp"] is not None else None

    return dict(w_demod=w_demod_t, x_cols=x_cols, noise=noise_rows,
                noise_per_batch=noise_per_batch, bias=conv_b,
                act_gain=act_gain, act_clamp=act_clamp,
                B=B, Cout=Cout, KKC=KKC, HW=HW, H=H, W=Wd)


# --------------------------------------------------------------------------------------
# Generation-aware tile / VMEM-limit selection (v5e/v6e: 128 MiB VMEM, v7x: 64 MiB per TC).
# --------------------------------------------------------------------------------------
def _select_tiling(HW, KKC, Cout):
    try:
        info = pltpu.get_tpu_info()
        vmem_cap = int(getattr(info, "vmem_capacity_bytes", 64 * 1024 * 1024))
    except Exception:
        vmem_cap = 64 * 1024 * 1024                       # conservative (v7x per-TC)
    vmem_limit = int(min((vmem_cap * 3) // 4, 100 * 1024 * 1024))

    # Small / oddly-sized feature maps: one full-HW tile (keeps the output lane-dense and
    # avoids per-step overhead dominating low-resolution layers).
    if HW % 128 != 0 or HW <= 1024:
        return int(HW), vmem_limit

    # Double-buffered per-step bytes: weight + bias are hw-invariant; x / out / noise scale
    # with the tile width.  (Weight is per-batch now, so it cannot be single-buffered.)
    fixed = 2 * (Cout * KKC * 2 + Cout * 4)
    per_col = 2 * (KKC * 2 + Cout * 4 + 4)
    avail = vmem_limit - fixed - (4 << 20)                 # headroom for compiler scratch
    tile = max((avail // per_col) // 128 * 128, 128)
    tile = int(min(tile, HW, 4096))
    while HW % tile != 0:                                  # HW % 128 == 0, so this terminates
        tile -= 128
    return int(tile), vmem_limit


# --------------------------------------------------------------------------------------
# Public forward: SynthesisLayerWrapper.forward (up=1, f32) fused into one pallas_call.
# --------------------------------------------------------------------------------------
def synthesis_layer_wrapper_forward(x, w, params, *, noise_mode="const", gain=1.0,
                                    noise_key=None, hw_tile=None):
    """x: (B, Cin, H, W) NCHW float32, w: (B, w_dim). Returns NCHW (B, Cout, H, W)."""
    assert noise_mode in ("random", "const", "none")
    st = _stage_inputs(x, w, params, noise_mode=noise_mode, gain=gain, noise_key=noise_key)
    B, Cout, KKC, HW = st["B"], st["Cout"], st["KKC"], st["HW"]

    tile, vmem_limit = _select_tiling(HW, KKC, Cout)
    if hw_tile is not None:
        tile = int(hw_tile)
    assert HW % tile == 0, (HW, tile)
    nt = HW // tile

    per_batch_noise = st["noise_per_batch"]
    noise_map = (lambda b, t: (b, 0, t)) if per_batch_noise else (lambda b, t: (0, 0, t))

    kernel = partial(_synthesis_kernel, act_gain=st["act_gain"],
                     act_clamp=st["act_clamp"], lrelu_alpha=0.2)

    # NOTE: after moving the demodulated weight to a per-batch operand there is no large
    # grid-invariant operand left to single-buffer; the (Cout, 1) bias is negligible.
    out = pl.pallas_call(
        kernel,
        out_shape=jax.ShapeDtypeStruct((B, Cout, HW), x.dtype),
        grid=(B, nt),
        in_specs=[
            pl.BlockSpec((1, Cout, KKC), lambda b, t: (b, 0, 0)),    # per-batch demod weight (bf16)
            pl.BlockSpec((1, KKC, tile), lambda b, t: (b, 0, t)),    # im2col columns (bf16)
            pl.BlockSpec((1, 1, tile), noise_map),                   # noise row (f32)
            pl.BlockSpec((Cout, 1), lambda b, t: (0, 0)),            # conv bias (f32)
        ],
        out_specs=pl.BlockSpec((1, Cout, tile), lambda b, t: (b, 0, t)),
        compiler_params=pltpu.CompilerParams(
            dimension_semantics=("parallel", "parallel"),
            vmem_limit_bytes=vmem_limit),
    )(st["w_demod"], st["x_cols"], st["noise"], st["bias"])

    # (B, Cout, HW) -> NCHW is a free reshape (no transpose).
    return out.reshape(B, Cout, st["H"], st["W"])


if __name__ == "__main__":
    key = jax.random.PRNGKey(0)
    keys = jax.random.split(key, 10)

    # small shapes consistent with the module
    B, Cin, Cout, K = 2, 16, 16, 3
    H = W = 16           # resolution (up=1, so in_resolution == resolution)
    W_DIM = 32           # latent w dimension (affine in_features)
    R = 4                # LoRA rank
    LORA_ALPHA = 1

    x = jax.random.normal(keys[0], (B, Cin, H, W), jnp.float32)
    w_lat = jax.random.normal(keys[1], (B, W_DIM), jnp.float32)

    def kaiming_uniform(k, shape):
        fan_in = shape[1]
        bound = math.sqrt(6.0 / ((1.0 + 5.0) * fan_in))   # a=sqrt(5)
        return jax.random.uniform(k, shape, jnp.float32, -bound, bound)

    params = {
        "r": R,
        "lora_alpha": LORA_ALPHA,
        # affine FullyConnectedLayer(w_dim -> Cin, bias_init=1)
        "fc_weight": jax.random.normal(keys[2], (Cin, W_DIM), jnp.float32),
        "fc_bias": jnp.ones((Cin,), jnp.float32),
        "fc_lora_A": kaiming_uniform(keys[3], (R, W_DIM)),
        "fc_lora_B": jnp.zeros((Cin, R), jnp.float32),    # LoRA init (zeros); still computed
        # synthesis conv
        "conv_weight": jax.random.normal(keys[4], (Cout, Cin, K, K), jnp.float32),
        "conv_bias": 0.1 * jax.random.normal(keys[5], (Cout,), jnp.float32),
        "conv_lora_A": kaiming_uniform(keys[6], (R * K, Cin * K)),
        "conv_lora_B": jnp.zeros((Cout * K, R * K), jnp.float32),  # LoRA init (zeros)
        # noise
        "noise_const": jax.random.normal(keys[7], (H, W), jnp.float32),
        "noise_strength": jnp.float32(0.1),
        "conv_clamp": 256.0,
    }

    out = synthesis_layer_wrapper_forward(x, w_lat, params, noise_mode="const", gain=1.0)
    out = jax.block_until_ready(out)
    assert out.shape == (B, Cout, H, W), out.shape
    assert bool(jnp.all(jnp.isfinite(out)))

    # Plain-JAX reference built from the same staged (bf16) operands: validates the Pallas
    # grid / BlockSpec plumbing and the fused epilogue without penalizing the intentional
    # bf16 quantization of the matmul inputs.
    st = _stage_inputs(x, w_lat, params, noise_mode="const", gain=1.0, noise_key=None)
    y = jnp.einsum("boc,bct->bot", st["w_demod"], st["x_cols"],
                   preferred_element_type=jnp.float32)
    y = y + st["noise"].astype(jnp.float32) + st["bias"][None].astype(jnp.float32)
    y = jnp.where(y >= 0.0, y, 0.2 * y) * st["act_gain"]
    if st["act_clamp"] is not None:
        y = jnp.clip(y, -st["act_clamp"], st["act_clamp"])
    ref = y.reshape(B, Cout, H, W)
    max_err = float(jnp.max(jnp.abs(out - ref)))
    assert max_err < 2e-3, max_err

    print("KERNEL_OK")
</pallas_src>

<mosaic_0001>
module attributes {stable_mosaic.version = 11 : i64} {
  func.func @_synthesis_kernel(%arg0: i32, %arg1: i32, %arg2: memref<1x16x144xbf16, #tpu.memory_space<vmem>>, %arg3: memref<1x144x256xbf16, #tpu.memory_space<vmem>>, %arg4: memref<1x1x256xf32, #tpu.memory_space<vmem>>, %arg5: memref<16x1xf32, #tpu.memory_space<vmem>>, %arg6: memref<1x16x256xf32, #tpu.memory_space<vmem>>) attributes {dimension_semantics = [#tpu.dimension_semantics<parallel>, #tpu.dimension_semantics<parallel>], iteration_bounds = array<i64: 2, 1>, scalar_prefetch = 0 : i64, scratch_operands = 0 : i64, tpu.core_type = #tpu.core_type<tc>, window_params = [{transform_indices = @transform_0, window_bounds = array<i64: 1, 16, 144>}, {transform_indices = @transform_1, window_bounds = array<i64: 1, 144, 256>}, {transform_indices = @transform_2, window_bounds = array<i64: 1, 1, 256>}, {pipeline_mode = #tpu.pipeline_mode<synchronous>, transform_indices = @transform_3, window_bounds = array<i64: 16, 1>}, {transform_indices = @transform_4, window_bounds = array<i64: 1, 16, 256>}]} {
    %c0 = arith.constant 0 : index
    %c0_0 = arith.constant 0 : index
    %c0_1 = arith.constant 0 : index
    %0 = vector.load %arg2[%c0, %c0_0, %c0_1] : memref<1x16x144xbf16, #tpu.memory_space<vmem>>, vector<1x16x144xbf16>
    %1 = vector.shape_cast %0 : vector<1x16x144xbf16> to vector<16x144xbf16>
    %c0_2 = arith.constant 0 : index
    %c0_3 = arith.constant 0 : index
    %c0_4 = arith.constant 0 : index
    %2 = vector.load %arg3[%c0_2, %c0_3, %c0_4] : memref<1x144x256xbf16, #tpu.memory_space<vmem>>, vector<1x144x256xbf16>
    %3 = vector.shape_cast %2 : vector<1x144x256xbf16> to vector<144x256xbf16>
    %cst = arith.constant dense<0.000000e+00> : vector<16x256xf32>
    %4 = tpu.matmul %1, %3, %cst {dimension_numbers = #tpu.dot_dimension_numbers<[1], [0], [0], [1], [0, 0, 1, 1], [], []>} : vector<16x144xbf16>, vector<144x256xbf16>, vector<16x256xf32> -> vector<16x256xf32>
    %c0_5 = arith.constant 0 : index
    %c0_6 = arith.constant 0 : index
    %c0_7 = arith.constant 0 : index
    %5 = vector.load %arg4[%c0_5, %c0_6, %c0_7] : memref<1x1x256xf32, #tpu.memory_space<vmem>>, vector<1x1x256xf32>
    %6 = vector.shape_cast %5 : vector<1x1x256xf32> to vector<1x256xf32>
    %7 = vector.broadcast %6 : vector<1x256xf32> to vector<16x256xf32>
    %8 = arith.addf %4, %7 : vector<16x256xf32>
    %c0_8 = arith.constant 0 : index
    %c0_9 = arith.constant 0 : index
    %9 = vector.load %arg5[%c0_8, %c0_9] : memref<16x1xf32, #tpu.memory_space<vmem>>, vector<16x1xf32>
    %10 = vector.broadcast %9 : vector<16x1xf32> to vector<16x256xf32>
    %11 = arith.addf %8, %10 : vector<16x256xf32>
    %cst_10 = arith.constant 0.000000e+00 : f32
    %12 = vector.broadcast %cst_10 : f32 to vector<16x256xf32>
    %13 = arith.cmpf oge, %11, %12 : vector<16x256xf32>
    %cst_11 = arith.constant 2.000000e-01 : f32
    %14 = vector.broadcast %cst_11 : f32 to vector<16x256xf32>
    %15 = arith.mulf %14, %11 : vector<16x256xf32>
    %16 = arith.select %13, %11, %15 : vector<16x256xi1>, vector<16x256xf32>
    %cst_12 = arith.constant 1.41421354 : f32
    %17 = vector.broadcast %cst_12 : f32 to vector<16x256xf32>
    %18 = arith.mulf %16, %17 : vector<16x256xf32>
    %cst_13 = arith.constant -2.560000e+02 : f32
    %cst_14 = arith.constant 2.560000e+02 : f32
    %19 = vector.broadcast %cst_13 : f32 to vector<16x256xf32>
    %20 = arith.maximumf %19, %18 : vector<16x256xf32>
    %21 = vector.broadcast %cst_14 : f32 to vector<16x256xf32>
    %22 = arith.minimumf %21, %20 : vector<16x256xf32>
    %c0_15 = arith.constant 0 : index
    %c0_16 = arith.constant 0 : index
    %c0_17 = arith.constant 0 : index
    %23 = vector.load %arg6[%c0_15, %c0_16, %c0_17] : memref<1x16x256xf32, #tpu.memory_space<vmem>>, vector<1x16x256xf32>
    %24 = vector.shape_cast %23 : vector<1x16x256xf32> to vector<16x256xf32>
    %25 = vector.shape_cast %22 : vector<16x256xf32> to vector<1x16x256xf32>
    tpu.vector_store %arg6[%c0_15, %c0_16, %c0_17], %25 {strides = array<i32>} : memref<1x16x256xf32, #tpu.memory_space<vmem>>, vector<1x16x256xf32>,
    return
  }
  func.func @transform_0(%arg0: i32, %arg1: i32) -> (i32, i32, i32) {
    %c0_i32 = arith.constant 0 : i32
    %c0_i32_0 = arith.constant 0 : i32
    %c0_i32_1 = arith.constant 0 : i32
    return %arg0, %c0_i32, %c0_i32_0 : i32, i32, i32
  }
  func.func @transform_1(%arg0: i32, %arg1: i32) -> (i32, i32, i32) {
    %c0_i32 = arith.constant 0 : i32
    %c0_i32_0 = arith.constant 0 : i32
    return %arg0, %c0_i32, %arg1 : i32, i32, i32
  }
  func.func @transform_2(%arg0: i32, %arg1: i32) -> (i32, i32, i32) {
    %c0_i32 = arith.constant 0 : i32
    %c0_i32_0 = arith.constant 0 : i32
    %c0_i32_1 = arith.constant 0 : i32
    return %c0_i32, %c0_i32_0, %arg1 : i32, i32, i32
  }
  func.func @transform_3(%arg0: i32, %arg1: i32) -> (i32, i32) {
    %c0_i32 = arith.constant 0 : i32
    %c0_i32_0 = arith.constant 0 : i32
    %c0_i32_1 = arith.constant 0 : i32
    return %c0_i32, %c0_i32_0 : i32, i32
  }
  func.func @transform_4(%arg0: i32, %arg1: i32) -> (i32, i32, i32) {
    %c0_i32 = arith.constant 0 : i32
    %c0_i32_0 = arith.constant 0 : i32
    return %arg0, %c0_i32, %arg1 : i32, i32, i32
  }
}

</mosaic_0001>

<bundles_post_ra>
// kernel: tpu_custom_call.1
= control target key start
LH: loop header
LB: loop body
LE: loop exit
PB: predicated region body
PF: predicated region fallthrough
CT: control target
= control target key end

     0   :  { %s1191_s0 = inlined_call_operand.hbm [shape: bf16[2,16,144], index: 0, kind: input, shape index: {}]   ;;  %s1192_s1 = inlined_call_operand.hbm [shape: bf16[2,144,256], index: 1, kind: input, shape index: {}]   ;;  %s1193_s2 = inlined_call_operand.vmem [shape: f32[1,1,256], index: 2, kind: input, shape index: {}]   ;;  %s1194_s3 = inlined_call_operand.vmem [shape: f32[16,1], index: 3, kind: input, shape index: {}]   ;;  %s1195_s4 = inlined_call_operand.hbm [shape: f32[2,16,256], index: 4, kind: output, shape index: {}]  }
   0x1   :  { %1197 = sst [smem:[#allocation12_spill]] %s1191_s0 }
   0x2   :  { %9 = vsyncpa [#allocation3], 0 }
   0x3   :  { %11 = vsyncpa [#allocation3 + $0x1], 0 }
   0x4   :  { %12 = vsyncpa [#allocation6], 0 }
   0x5   :  { %14 = vsyncpa [#allocation6 + $0x1], 0 }
   0x6   :  { %15 = vsyncpa [#allocation4], 0 }
   0x7   :  { %17 = vsyncpa [#allocation4 + $0x1], 0  ;;  %s981_s15 = smov 0   ;;  %s983_s16 = smov 0  }
   0x8   :  { %s985_s17 = smov 0   ;;  %s987_s18 = smov 0  }
   0x9   :  { %s989_s19 = smov 0   ;;  %s991_s20 = smov 0  }
   0xa LB: > { %s656_s21 = sadd.s32 4294967295, %s946_s20   ;;  %s657_s22 = sadd.s32 4294967294, %s946_s20   ;;  %s946_s20 = sphi %s991_s20, %s23_s20   ;;  %s942_s19 = sphi %s989_s19, %s1211_s19   ;;  %s938_s18 = sphi %s987_s18, %s1210_s18   ;;  %s934_s17 = sphi %s985_s17, %s1209_s17   ;;  %s930_s16 = sphi %s983_s16, %s1208_s16   ;;  %s926_s15 = sphi %s981_s15, %s1207_s15  }
   0xb   : > { %s35_s23 = sadd.s32 1, %s942_s19  ;;  %s42_s24 = sadd.s32 1, %s934_s17 }
   0xc   : > { %p37_p0 = scmp.ge.s32.totalorder %s35_s23, 2  ;;  %p49_p1 = scmp.ne.s32.totalorder %s934_s17, %s930_s16 }
   0xd   : > { %p50_p2 = scmp.eq.s32.totalorder %s946_s20, 0  ;;  %p55_p3 = scmp.ne.s32.totalorder %s930_s16, %s926_s15 }
   0xe   : > { %s1213_s23 = smov (%p37_p0, %s35_s23), 0  ;;  %p56_p5 = scmp.eq.s32.totalorder %s656_s21, 0 }
   0xf   : > { %1198 = sst [smem:[#allocation11_spill]] %s1213_s23  ;;  %p1022_p4 = por %p50_p2, %p49_p1 }
  0x10   : > { %s39_s26 = ssub.s32 %s942_s19, %s1213_s23  ;;  %p156_p6 = scmp.eq.s32.totalorder %s656_s21, 1 }
  0x11   : > { %p40_p7 = scmp.eq.s32.totalorder %s39_s26, 0  ;;  %p1028_p8 = por %p56_p5, %p55_p3 }
  0x12   : > { %p1032_p9 = por %p156_p6, %p49_p1  ;;  %p162_p10 = scmp.eq.s32.totalorder %s657_s22, 1 }
  0x13   : > { %s1037_s29 = scalar_select %p40_p7, %s934_s17, %s42_s24  }
  0x14   : > { %p1039_p11 = por %p162_p10, %p55_p3  ;;  %p660_p12 = scmp.ge.s32.totalorder %s946_s20, 2 }
  0x15   : > { %p720_p13 = scmp.lt.s32.totalorder %s946_s20, 2  ;;  %s1046_s5 = sand.u32 1, %s934_s17  }
  0x16   : > { %s661_s6 = sshll.u32 %s1046_s5, 4  ;;  %s698_s7 = sshll.u32 %s942_s19, 8 }
  0x17   : > { %s1203_s0 = sld [smem:[#allocation12_spill]]  ;;  %s197_s11 = scalar_lea.vmem [#allocation2], %s661_s6 }
  0x18   : > { %s204_s12 = sshll.u32 %s197_s11, 4  ;;  %p1055_p0 = pnand %p720_p13, %p1022_p4  ;;  %s205_s12 = int_to_ptr.vmem [resolvable:$true] %s204_s12 }
  0x19   : > { %p665_p1 = scmp.ge.s32.totalorder %s946_s20, 1  ;;  %s194_s14 = scalar_lea.sflag [#allocation3], %s1046_s5 }
  0x1a   : > { %p808_p2 = pneg %p1055_p0  ;;  %s819_s21 = scalar_lea.vmem %s205_s12, 256 }
  0x1b   : > { %p820_p3 = scmp.ne.s32.totalorder %s205_s12, %s819_s21  ;;  %s948_s22 = smov [#allocation2]  }
  0x1c   : > { %s824_s24 = sshll.u32 %s948_s22, 4  ;;  %s825_s24 = int_to_ptr.vmem [resolvable:$false] %s824_s24 }
  0x1d   : > { %s203_s10 = scalar_lea.hbm %s1203_s0, %s698_s7  ;;  %p822_p5 = pnand %p820_p3, %p808_p2 }
  0x1e   : > { %s826_s25 = scalar_lea.vmem %s825_s24, 512  ;;  %p827_p4 = scmp.lt.s32.totalorder %s205_s12, %s825_s24 }
  0x1f   : > { %p823_p6 = pneg %p822_p5  ;;  %p828_p7 = scmp.lt.s32.totalorder %s826_s25, %s819_s21 }
  0x21   : > { %p829_p10 = por %p828_p7, %p827_p4 }
  0x23   : > { %p830_p13 = pnand %p829_p10, %p823_p6 }
  0x25   : > { %833 = shalt.err (!%p830_p13)
}
  0x26   : > { %s949_s26 = smov 128   ;;  %s950_s6 = smov 8  }
  0x27   : > { %712 = dma.hbm_to_vmem [thread:$0]  (!%p1055_p0), %s203_s10, 256, %s205_s12, %s194_s14, %s949_s26, %s949_s26, %s950_s6  }
  0x28   : > { %p235_p3 = scmp.lt.s32.totalorder %s946_s20, 3  ;;  %s700_s7 = smul.u32 144, %s1046_s5 }
  0x29   : > { %s701_s9 = smul.u32 2304, %s942_s19  ;;  %s215_s0 = scalar_lea.sflag [#allocation6], %s1046_s5 }
  0x2a   : > { %p1072_p5 = pnand %p665_p1, %p235_p3  ;;  %s218_s24 = scalar_lea.vmem [#allocation5], %s700_s7 }
  0x2b   : > { %s226_s22 = scalar_lea.hbm %s1192_s1, %s701_s9  ;;  %s227_s25 = sshll.u32 %s218_s24, 4  ;;  %s228_s25 = int_to_ptr.vmem [resolvable:$true] %s227_s25 }
  0x2c   : > { %s847_s23 = scalar_lea.vmem %s228_s25, 2304  ;;  %s951_s10 = smov [#allocation5]  }
  0x2d   : > { %p848_p6 = scmp.ne.s32.totalorder %s228_s25, %s847_s23  ;;  %s852_s12 = sshll.u32 %s951_s10, 4  ;;  %s853_s12 = int_to_ptr.vmem [resolvable:$false] %s852_s12 }
  0x2e   : > { %s854_s14 = scalar_lea.vmem %s853_s12, 4608  ;;  %p855_p1 = scmp.lt.s32.totalorder %s228_s25, %s853_s12 }
  0x2f   : > { %p850_p4 = pnand %p848_p6, %p808_p2  ;;  %p856_p10 = scmp.lt.s32.totalorder %s854_s14, %s847_s23 }
  0x31   : > { %p851_p7 = pneg %p850_p4  ;;  %p857_p13 = por %p856_p10, %p855_p1 }
  0x33   : > { %p858_p3 = pnand %p857_p13, %p851_p7 }
  0x35   : > { %861 = shalt.err (!%p858_p3)
}
  0x36   : > { %715 = dma.hbm_to_vmem [thread:$0]  (!%p1055_p0), %s226_s22, 2304, %s228_s25, %s215_s0, %s949_s26, %s949_s26, %s950_s6  }
  0x37   : > { %239 = sbr.rel (%p1072_p5) target bundleno = 327 (0x147), region = 36  ;;  %s1089_s5 = sand.u32 (!%p1072_p5), 1, %s930_s16  }
  0x38   : > { %s666_s7 = sshll.u32 (!%p1072_p5), %s1089_s5, 4  ;;  %s242_s9 = scalar_lea.sflag (!%p1072_p5), [#allocation3], %s1089_s5 }
  0x39   : > { %s1093_s11 = scalar_lea.vmem (!%p1072_p5), [#allocation2], %s666_s7 }
  0x3c   : > { %913 = dma.done.wait (%p1028_p8), %s242_s9, 256  }
  0x3d   : > { %915 = vsyncadd (%p1028_p8), %s242_s9, 4294967040  ;;  %s702_s0 = smul.u32 144, %s1089_s5  ;;  %s251_s23 = scalar_lea.sflag [#allocation6], %s1089_s5 }
  0x3f   : > { %s1101_s13 = scalar_lea.vmem [#allocation5], %s702_s0 }
  0x40   : > { %917 = dma.done.wait (%p1028_p8), %s251_s23, 2304  }
  0x41   : > { %919 = vsyncadd (%p1028_p8), %s251_s23, 4294964992  ;;  %v952_v0 = vmov 0   ;;  %v776_v1 = vld [vmem:[%s1101_s13 + $0x74] ss:$8 sps:$4 sm:$0xff]   ;;  %v778_v2 = vld [vmem:[%s1101_s13 + $0x70] ss:$8 sps:$4 sm:$0xff]   ;;  %v318_v23 = vlaneseq }
  0x42   : > { %775 = vset.pattern.permute.xlu0 %v952_v0  ;;  %431 = vmatprep.subr.bf16.mxu0 %v776_v1  ;;  %v779_v3 = vld [vmem:[%s1101_s13 + $0x64] ss:$8 sps:$4 sm:$0xff]   ;;  %v781_v4 = vld [vmem:[%s1101_s13 + $0x60] ss:$8 sps:$4 sm:$0xff]   ;;  %v782_v5 = vld [vmem:[%s1101_s13 + $0x54] ss:$8 sps:$4 sm:$0xff]  }
  0x43   : > { %432 = vmatpush1.bf16.msra.mxu0 %v778_v2  ;;  %v784_v6 = vld [vmem:[%s1101_s13 + $0x50] ss:$8 sps:$4 sm:$0xff]   ;;  %v785_v7 = vld [vmem:[%s1101_s13 + $0x44] ss:$8 sps:$4 sm:$0xff]   ;;  %v787_v8 = vld [vmem:[%s1101_s13 + $0x40] ss:$8 sps:$4 sm:$0xff]  }
  0x44   : > { %433 = vmatprep.subr.bf16.mxu0 %v779_v3  ;;  %v788_v9 = vld [vmem:[%s1101_s13 + $0x34] ss:$8 sps:$4 sm:$0xff]   ;;  %vm427_vm0 = vcmask 130048   ;;  %v805_v10 = vld [vmem:[%s1093_s11 + $0x4] ss:$8 sps:$4 sm:$0xff]   ;;  %v319_v24 = vshrl.u32 %v318_v23, 7 }
  0x45   : > { %v474_v11 = vld [vmem:[%s1194_s3] sm:$0xff]  ;;  %688 = vmatprep.mubr.msk.bf16.mxu0 %vm427_vm0, %v805_v10  ;;  %v475_v13 = vld [vmem:[%s1194_s3 + $0x8] sm:$0xff]  ;;  %s667_s24 = sshll.u32 %s1089_s5, 5  ;;  %s699_s10 = sshll.u32 %s938_s18, 9 }
  0x46   : > { %478 = vperm.xlu0 %775, %v474_v11   ;;  %v790_v12 = vld [vmem:[%s1101_s13 + $0x30] ss:$8 sps:$4 sm:$0xff]   ;;  %v791_v14 = vld [vmem:[%s1101_s13 + $0x24] ss:$8 sps:$4 sm:$0xff]   ;;  %v793_v15 = vld [vmem:[%s1101_s13 + $0x20] ss:$8 sps:$4 sm:$0xff]   ;;  %s1141_s9 = scalar_lea.hbm %s1195_s4, %s699_s10 }
  0x47   : > { %434 = vmatpush1.bf16.msra.mxu0 %v781_v4  ;;  %v794_v16 = vld [vmem:[%s1101_s13 + $0x14] ss:$8 sps:$4 sm:$0xff]   ;;  %v796_v17 = vld [vmem:[%s1101_s13 + $0x10] ss:$8 sps:$4 sm:$0xff]   ;;  %v797_v18 = vld [vmem:[%s1101_s13 + $0x4] ss:$8 sps:$4 sm:$0xff]  }
  0x48   : > { %435 = vmatprep.subr.bf16.mxu0 %v782_v5  ;;  %v799_v19 = vld [vmem:[%s1101_s13] ss:$8 sps:$4 sm:$0xff]   ;;  %v800_v20 = vld [vmem:[%s1101_s13 + $0x84] ss:$8 sps:$4 sm:$0xff]   ;;  %v320_v25 = vsub.s32 0, %v319_v24  ;;  %v324_v27 = vsub.s32 1, %v319_v24 }
  0x49   : > { %v802_v21 = vld [vmem:[%s1101_s13 + $0x80] ss:$8 sps:$4 sm:$0xff]   ;;  %s287_s25 = scalar_lea.vmem [#allocation7], %s667_s24  ;;  %s953_s0 = smov [#allocation7]  }
  0x4a   : > { %483 = vperm.xlu0 %775, %v475_v13   ;;  %v803_v22 = vld [vmem:[%s1093_s11] ss:$8 sps:$4 sm:$0xff]   ;;  %s534_s12 = sshll.u32 %s287_s25, 4  ;;  %s519_s11 = scalar_lea.sflag [#allocation4], %s1089_s5  ;;  %s1143_s12 = int_to_ptr.vmem [resolvable:$true] %s534_s12 }
  0x4b   : > { %436 = vmatpush1.bf16.msra.mxu0 %v784_v6  ;;  %v316_v26 = vld [vmem:[%s1193_s2] sm:$0x3]  ;;  %s862_s18 = scalar_lea.vmem %s1143_s12, 512  ;;  %s866_s23 = sshll.u32 %s953_s0, 4  ;;  %s867_s23 = int_to_ptr.vmem [resolvable:$false] %s866_s23 }
  0x4c   : > { %437 = vmatprep.subr.bf16.mxu0 %v785_v7  ;;  %v321_v28 = vrot.slane %v316_v26, %v320_v25  ;;  %v325_v29 = vrot.slane %v316_v26, %v324_v27  ;;  %p863_p8 = scmp.ne.s32.totalorder %s1143_s12, %s862_s18  ;;  %s868_s13 = scalar_lea.vmem %s867_s23, 1024 }
  0x4d   : > { %p869_p5 = scmp.lt.s32.totalorder %s1143_s12, %s867_s23  ;;  %p870_p6 = scmp.lt.s32.totalorder %s868_s13, %s862_s18 }
  0x4e   : > { %p864_p0 = pnand %p863_p8, %p1032_p9 }
  0x4f   : > { %438 = vmatpush1.bf16.msra.mxu0 %v787_v8  ;;  %p871_p4 = por %p870_p6, %p869_p5 }
  0x50   : > { %439 = vmatprep.subr.bf16.mxu0 %v788_v9  ;;  %p865_p2 = pneg %p864_p0 }
  0x52   : > { %p872_p7 = pnand %p871_p4, %p865_p2 }
  0x53   : > { %440 = vmatpush1.bf16.msra.mxu0 %v790_v12 }
  0x54   : > { %441 = vmatprep.subr.bf16.mxu0 %v791_v14 }
  0x57   : > { %442 = vmatpush1.bf16.msra.mxu0 %v793_v15 }
  0x58   : > { %443 = vmatprep.subr.bf16.mxu0 %v794_v16 }
  0x5b   : > { %444 = vmatpush1.bf16.msra.mxu0 %v796_v17 }
  0x5c   : > { %445 = vmatprep.subr.bf16.mxu0 %v797_v18 }
  0x5f   : > { %446 = vmatpush1.bf16.msra.mxu0 %v799_v19 }
  0x60   : > { %461 = vmatprep.subr.bf16.mxu0 %v800_v20 }
  0x63   : > { %462 = vmatpush2.bf16.msra.mxu0 %v802_v21 }
  0x66   : > { %464 = vmatmul.mubr.bf16.vlgmr.msra.gmra.mxu0 %v803_v22 }
  0xc1   : > { %v479_v30 = vpop.permute.xlu0 %478 }
  0xc5   : > { %v484_v40 = vpop.permute.xlu0 %483 }
 0x126   : > { %v465_v31 = vpop.f32.mrf.mxu0 }
 0x127   : > { %v466_v32 = vadd.f32 %v465_v31, %v321_v28 }
 0x128   : > { %v467_v33 = vpop.f32.mrf.mxu0 }
 0x129   : > { %v486_v34 = vadd.f32 %v479_v30, %v466_v32  ;;  %v468_v35 = vadd.f32 %v467_v33, %v325_v29 }
 0x12a   : > { %v469_v36 = vpop.f32.mrf.mxu0 }
 0x12b   : > { %vm490_vm1 = vcmp.ge.f32.partialorder %v486_v34, 0.0  ;;  %v494_v37 = vmul.f32 0.2, %v486_v34  ;;  %v487_v38 = vadd.f32 %v479_v30, %v468_v35  ;;  %v470_v39 = vadd.f32 %v469_v36, %v321_v28 }
 0x12c   : > { %v471_v41 = vpop.f32.mrf.mxu0 }
 0x12d   : > { %v498_v42 = vsel %vm490_vm1, %v486_v34, %v494_v37  ;;  %vm491_vm2 = vcmp.ge.f32.partialorder %v487_v38, 0.0  ;;  %v495_v43 = vmul.f32 0.2, %v487_v38  ;;  %v488_v44 = vadd.f32 %v484_v40, %v470_v39 }
 0x12e   : > { %v502_v45 = vmul.f32 1.4142135, %v498_v42  ;;  %v472_v46 = vadd.f32 %v471_v41, %v325_v29 }
 0x12f   : > { %v499_v47 = vsel %vm491_vm2, %v487_v38, %v495_v43  ;;  %vm492_vm3 = vcmp.ge.f32.partialorder %v488_v44, 0.0  ;;  %v496_v48 = vmul.f32 0.2, %v488_v44 }
 0x130   : > { %v689_v49 = vclamps-f32 %v502_v45, 256.0  ;;  %v503_v50 = vmul.f32 1.4142135, %v499_v47  ;;  %v489_v51 = vadd.f32 %v484_v40, %v472_v46 }
 0x131   : > { %v500_v52 = vsel %vm492_vm3, %v488_v44, %v496_v48 }
 0x132   : > { %514 = vst [vmem:[%s287_s25] sm:$0xff] %v689_v49  ;;  %v690_v53 = vclamps-f32 %v503_v50, 256.0  ;;  %v504_v54 = vmul.f32 1.4142135, %v500_v52  ;;  %vm493_vm4 = vcmp.ge.f32.partialorder %v489_v51, 0.0  ;;  %v497_v55 = vmul.f32 0.2, %v489_v51 }
 0x134   : > { %515 = vst [vmem:[%s287_s25 + $0x8] sm:$0xff] %v690_v53  ;;  %v691_v56 = vclamps-f32 %v504_v54, 256.0  ;;  %v501_v57 = vsel %vm493_vm4, %v489_v51, %v497_v55 }
 0x135   : > { %v505_v58 = vmul.f32 1.4142135, %v501_v57 }
 0x136   : > { %516 = vst [vmem:[%s287_s25 + $0x10] sm:$0xff] %v691_v56 }
 0x137   : > { %v692_v59 = vclamps-f32 %v505_v58, 256.0 }
 0x139   : > { %517 = vst [vmem:[%s287_s25 + $0x18] sm:$0xff] %v692_v59 }
 0x13a   : > { %875 = shalt.err (!%p872_p7)
}
 0x13b   : > { %s876_s27 = scalar_lea.hbm %s1141_s9, 512  ;;  %s880_s8 = scalar_lea.hbm %s1195_s4, 1024 }
 0x13c   : > { %p877_p1 = scmp.ne.s32.totalorder %s1141_s9, %s876_s27  ;;  %p881_p3 = scmp.lt.s32.totalorder %s1141_s9, %s1195_s4 }
 0x13d   : > { %p882_p8 = scmp.lt.s32.totalorder %s880_s8, %s876_s27 }
 0x13e   : > { %p878_p10 = pnand %p877_p1, %p1032_p9 }
 0x13f   : > { %p883_p0 = por %p882_p8, %p881_p3 }
 0x140   : > { %p879_p13 = pneg %p878_p10 }
 0x142   : > { %p884_p2 = pnand %p883_p0, %p879_p13 }
 0x144   : > { %887 = shalt.err (!%p884_p2)
}
 0x145   : > { %s954_s24 = smov 256   ;;  %s955_s25 = smov 16  }
 0x146   : > { %707 = dma.vmem_to_hbm [thread:$0]  (%p1032_p9), %s1143_s12, 512, %s1141_s9, %s519_s11, %s954_s24, %s954_s24, %s955_s25  }
 0x147 PF: > { %s549_s10 = sand.u32 1, %s926_s15   ;;  %p717_p5 = pnand %p660_p12, %p1039_p11 }
 0x148   : > { %s550_s14 = scalar_lea.sflag [#allocation4], %s549_s10 }
 0x149   : > { %p718_p6 = pneg %p717_p5 }
 0x14b   : > { %921 = dma.done.wait (%p718_p6), %s550_s14, 512  }
 0x14c   : > { %923 = vsyncadd (%p718_p6), %s550_s14, 4294966784  ;;  %s23_s20 = sadd.s32 1, %s946_s20   ;;  %s1206_s28 = sld [smem:[#allocation11_spill]] }
 0x14d   : > { %p20_p4 = scmp.ge.s32.totalorder %s23_s20, 4   ;;  %s1207_s15 = smov %s930_s16 }
 0x14e   : > { %s1208_s16 = smov %s934_s17  ;;  %s1209_s17 = smov %s1037_s29 }
 0x14f   : > { %s1210_s18 = smov %s942_s19  ;;  %22 = sbr.rel (!%p20_p4) target bundleno = 10 (0xa), region = 97 }
 0x152   : > { %s1211_s19 = smov %s1206_s28 }
 0x154   :  { %555 = vsyncpa [#allocation3], 1 }
 0x155   :  { %557 = vsyncpa [#allocation3 + $0x1], 1 }
 0x156   :  { %558 = vsyncpa [#allocation6], 1 }
 0x157   :  { %560 = vsyncpa [#allocation6 + $0x1], 1 }
 0x158   :  { %561 = vsyncpa [#allocation4], 1 }
 0x159   :  { %563 = vsyncpa [#allocation4 + $0x1], 1 }

</bundles_post_ra>
